<compile_context>
chip_gen: v7x
topology: tpu7x:2x2x1
jax: 0.10.0
libtpu: 0.0.40
codegen_flags: <defaults>
</compile_context>

<pallas_src>
import functools

import jax
import jax.numpy as jnp
import numpy as np
from jax import lax
from jax.experimental import pallas as pl
from jax.experimental.pallas import tpu as pltpu


def _round_up(x, m):
    return ((x + m - 1) // m) * m


# ----------------------------- Pallas kernel -------------------------------
def gdn_kernel(x_ref, gamma_ref, beta_ref, o_ref, *, inverse):
    # x_ref:     (C, t_hw)  NCHW tile: channels on sublanes, pixels on lanes.
    # gamma_ref: (C, C)     already reparameterized; gamma[i, j] weights x[j]^2
    #                       for output channel i (matches conv2d orientation).
    # beta_ref:  (C, 1)     already reparameterized, broadcast along lanes.
    x = x_ref[...].astype(jnp.float32)
    x2 = x * x
    # norm[i, p] = sum_j gamma[i, j] * x[j, p]^2 + beta[i]
    norm = jnp.dot(gamma_ref[...], x2, preferred_element_type=jnp.float32)
    norm = norm + beta_ref[...]
    if inverse:
        out = x * jnp.sqrt(norm)
    else:
        out = x * lax.rsqrt(norm)          # one EUP op instead of sqrt + divide
    o_ref[...] = out.astype(o_ref.dtype)


# ----------------------------- host wrapper --------------------------------
def gdn_pallas(x_nchw, beta_param, gamma_param, *,
               beta_min=1e-6, reparam_offset=2.0 ** (-18),
               inverse=False, t_hw=2048):
    """GDN forward. x_nchw: (N, C, H, W) (or (N, C, D, H, W)) float32."""
    orig_shape = x_nchw.shape
    if x_nchw.ndim == 5:                    # "unfold" path of the torch module
        n5, c5, d5, h5, w5 = orig_shape
        x_nchw = x_nchw.reshape(n5, c5, d5 * h5, w5)
    n, c, h, w = x_nchw.shape
    hw = h * w

    # Grid-invariant reparameterization hoisted out of the kernel (host side).
    pedestal = reparam_offset ** 2
    beta_bound = (beta_min + pedestal) ** 0.5
    gamma_bound = reparam_offset
    beta_r = jnp.maximum(beta_param.astype(jnp.float32), beta_bound) ** 2 - pedestal
    gamma_r = jnp.maximum(gamma_param.astype(jnp.float32), gamma_bound) ** 2 - pedestal
    beta_r = beta_r.reshape(c, 1)

    # Spatial tiling: lane-dense tiles, padded to a multiple of 128.
    t = min(t_hw, _round_up(hw, 128))
    hw_pad = _round_up(hw, t)
    x_flat = x_nchw.reshape(n, c, hw)       # free view, no data movement
    if hw_pad != hw:
        # Padded pixels are zero -> norm = beta > 0 -> output 0 (no NaN/Inf).
        x_flat = jnp.pad(x_flat, ((0, 0), (0, 0), (0, hw_pad - hw)))

    kernel = functools.partial(gdn_kernel, inverse=inverse)

    cost = pl.CostEstimate(
        flops=int(2.0 * n * hw_pad * c * c + 4.0 * n * hw_pad * c),
        transcendentals=int(n * hw_pad * c),
        bytes_accessed=int(4 * (2 * n * c * hw_pad + c * c + c)),
    )

    out_flat = pl.pallas_call(
        kernel,
        out_shape=jax.ShapeDtypeStruct((n, c, hw_pad), x_flat.dtype),
        grid_spec=pltpu.PrefetchScalarGridSpec(
            num_scalar_prefetch=0,
            grid=(n, hw_pad // t),
            in_specs=[
                pl.BlockSpec((None, c, t), lambda b, s: (b, 0, s)),  # x tile
                pl.BlockSpec((c, c), lambda b, s: (0, 0)),           # gamma (resident)
                pl.BlockSpec((c, 1), lambda b, s: (0, 0)),           # beta  (resident)
            ],
            out_specs=pl.BlockSpec((None, c, t), lambda b, s: (b, 0, s)),
        ),
        compiler_params=pltpu.CompilerParams(
            dimension_semantics=("parallel", "parallel")),
        cost_estimate=cost,
    )(x_flat, gamma_r, beta_r)

    out = out_flat[:, :, :hw].reshape(n, c, h, w)
    if len(orig_shape) == 5:
        out = out.reshape(orig_shape)
    return out


# ------------------------ deterministic param init -------------------------
def init_gdn_params(ch, gamma_init=0.1, reparam_offset=2.0 ** (-18)):
    pedestal = reparam_offset ** 2
    beta = jnp.sqrt(jnp.ones((ch,), jnp.float32) + pedestal)
    gamma = jnp.sqrt(gamma_init * jnp.eye(ch, dtype=jnp.float32) + pedestal)
    return beta, gamma


# ------------------------------- reference ---------------------------------
def gdn_ref(x_nchw, beta_param, gamma_param, *,
            beta_min=1e-6, reparam_offset=2.0 ** (-18), inverse=False):
    pedestal = reparam_offset ** 2
    beta_bound = (beta_min + pedestal) ** 0.5
    gamma_bound = reparam_offset
    beta = jnp.maximum(beta_param, beta_bound) ** 2 - pedestal
    gamma = jnp.maximum(gamma_param, gamma_bound) ** 2 - pedestal
    # conv2d with 1x1 kernel == einsum over the channel dim
    norm = jnp.einsum('ij,njhw->nihw', gamma, x_nchw ** 2) + beta[None, :, None, None]
    norm = jnp.sqrt(norm)
    return x_nchw * norm if inverse else x_nchw / norm


if __name__ == "__main__":
    key = jax.random.PRNGKey(0)
    N, C, H, W = 2, 4, 16, 16
    x = jax.random.normal(key, (N, C, H, W), dtype=jnp.float32)

    beta_p, gamma_p = init_gdn_params(C)

    out = jax.block_until_ready(gdn_pallas(x, beta_p, gamma_p))
    ref = gdn_ref(x, beta_p, gamma_p)
    np.testing.assert_allclose(np.asarray(out), np.asarray(ref),
                               rtol=1e-5, atol=1e-5)

    out_inv = jax.block_until_ready(gdn_pallas(x, beta_p, gamma_p, inverse=True))
    ref_inv = gdn_ref(x, beta_p, gamma_p, inverse=True)
    np.testing.assert_allclose(np.asarray(out_inv), np.asarray(ref_inv),
                               rtol=1e-5, atol=1e-5)

    print("KERNEL_OK")
</pallas_src>

<mosaic_0001>
module attributes {stable_mosaic.version = 11 : i64} {
  func.func @gdn_kernel(%arg0: i32, %arg1: i32, %arg2: memref<1x4x256xf32, #tpu.memory_space<vmem>>, %arg3: memref<4x4xf32, #tpu.memory_space<vmem>>, %arg4: memref<4x1xf32, #tpu.memory_space<vmem>>, %arg5: memref<1x4x256xf32, #tpu.memory_space<vmem>>) attributes {dimension_semantics = [#tpu.dimension_semantics<parallel>, #tpu.dimension_semantics<parallel>], iteration_bounds = array<i64: 2, 1>, scalar_prefetch = 0 : i64, scratch_operands = 0 : i64, tpu.core_type = #tpu.core_type<tc>, window_params = [{transform_indices = @transform_0, window_bounds = array<i64: 1, 4, 256>}, {pipeline_mode = #tpu.pipeline_mode<synchronous>, transform_indices = @transform_1, window_bounds = array<i64: 4, 4>}, {pipeline_mode = #tpu.pipeline_mode<synchronous>, transform_indices = @transform_2, window_bounds = array<i64: 4, 1>}, {transform_indices = @transform_3, window_bounds = array<i64: 1, 4, 256>}]} {
    %c0 = arith.constant 0 : index
    %c0_0 = arith.constant 0 : index
    %c0_1 = arith.constant 0 : index
    %0 = vector.load %arg2[%c0, %c0_0, %c0_1] : memref<1x4x256xf32, #tpu.memory_space<vmem>>, vector<1x4x256xf32>
    %1 = vector.shape_cast %0 : vector<1x4x256xf32> to vector<4x256xf32>
    %2 = arith.mulf %1, %1 : vector<4x256xf32>
    %c0_2 = arith.constant 0 : index
    %c0_3 = arith.constant 0 : index
    %3 = vector.load %arg3[%c0_2, %c0_3] : memref<4x4xf32, #tpu.memory_space<vmem>>, vector<4x4xf32>
    %cst = arith.constant dense<0.000000e+00> : vector<4x256xf32>
    %4 = tpu.matmul %3, %2, %cst {dimension_numbers = #tpu.dot_dimension_numbers<[1], [0], [0], [1], [0, 0, 1, 1], [], []>} : vector<4x4xf32>, vector<4x256xf32>, vector<4x256xf32> -> vector<4x256xf32>
    %c0_4 = arith.constant 0 : index
    %c0_5 = arith.constant 0 : index
    %5 = vector.load %arg4[%c0_4, %c0_5] : memref<4x1xf32, #tpu.memory_space<vmem>>, vector<4x1xf32>
    %6 = vector.broadcast %5 : vector<4x1xf32> to vector<4x256xf32>
    %7 = arith.addf %4, %6 : vector<4x256xf32>
    %8 = math.rsqrt %7 : vector<4x256xf32>
    %9 = arith.mulf %1, %8 : vector<4x256xf32>
    %c0_6 = arith.constant 0 : index
    %c0_7 = arith.constant 0 : index
    %c0_8 = arith.constant 0 : index
    %10 = vector.load %arg5[%c0_6, %c0_7, %c0_8] : memref<1x4x256xf32, #tpu.memory_space<vmem>>, vector<1x4x256xf32>
    %11 = vector.shape_cast %10 : vector<1x4x256xf32> to vector<4x256xf32>
    %12 = vector.shape_cast %9 : vector<4x256xf32> to vector<1x4x256xf32>
    tpu.vector_store %arg5[%c0_6, %c0_7, %c0_8], %12 {strides = array<i32>} : memref<1x4x256xf32, #tpu.memory_space<vmem>>, vector<1x4x256xf32>,
    return
  }
  func.func @transform_0(%arg0: i32, %arg1: i32) -> (i32, i32, i32) {
    %c0_i32 = arith.constant 0 : i32
    %c0_i32_0 = arith.constant 0 : i32
    return %arg0, %c0_i32, %arg1 : i32, i32, i32
  }
  func.func @transform_1(%arg0: i32, %arg1: i32) -> (i32, i32) {
    %c0_i32 = arith.constant 0 : i32
    %c0_i32_0 = arith.constant 0 : i32
    %c0_i32_1 = arith.constant 0 : i32
    return %c0_i32, %c0_i32_0 : i32, i32
  }
  func.func @transform_2(%arg0: i32, %arg1: i32) -> (i32, i32) {
    %c0_i32 = arith.constant 0 : i32
    %c0_i32_0 = arith.constant 0 : i32
    %c0_i32_1 = arith.constant 0 : i32
    return %c0_i32, %c0_i32_0 : i32, i32
  }
  func.func @transform_3(%arg0: i32, %arg1: i32) -> (i32, i32, i32) {
    %c0_i32 = arith.constant 0 : i32
    %c0_i32_0 = arith.constant 0 : i32
    return %arg0, %c0_i32, %arg1 : i32, i32, i32
  }
}

</mosaic_0001>

<bundles_post_ra>
// kernel: tpu_custom_call.1
= control target key start
LH: loop header
LB: loop body
LE: loop exit
PB: predicated region body
PF: predicated region fallthrough
CT: control target
= control target key end

     0   :  { %8 = vsyncpa [#allocation3], 0  ;;  %s816_s0 = inlined_call_operand.hbm [shape: f32[2,4,256], index: 0, kind: input, shape index: {}]   ;;  %s817_s1 = inlined_call_operand.vmem [shape: f32[4,4], index: 1, kind: input, shape index: {}]   ;;  %s818_s2 = inlined_call_operand.vmem [shape: f32[4,1], index: 2, kind: input, shape index: {}]   ;;  %s819_s3 = inlined_call_operand.hbm [shape: f32[2,4,256], index: 3, kind: output, shape index: {}]  }
   0x1   :  { %10 = vsyncpa [#allocation3 + $0x1], 0 }
   0x2   :  { %11 = vsyncpa [#allocation4], 0 }
   0x3   :  { %13 = vsyncpa [#allocation4 + $0x1], 0  ;;  %s634_s12 = smov 0   ;;  %s636_s13 = smov 0  }
   0x4   :  { %s638_s14 = smov 0   ;;  %s640_s15 = smov 0  }
   0x5   :  { %s642_s16 = smov 0   ;;  %s644_s17 = smov 0  }
   0x6 LB: > { %s407_s18 = sadd.s32 4294967295, %s608_s17   ;;  %s408_s19 = sadd.s32 4294967294, %s608_s17   ;;  %s608_s17 = sphi %s644_s17, %s19_s17   ;;  %s604_s16 = sphi %s642_s16, %s835_s16   ;;  %s600_s15 = sphi %s640_s15, %s834_s15   ;;  %s596_s14 = sphi %s638_s14, %s833_s14   ;;  %s592_s13 = sphi %s636_s13, %s832_s13   ;;  %s588_s12 = sphi %s634_s12, %s831_s12  }
   0x7   : > { %s31_s20 = sadd.s32 1, %s604_s16  ;;  %s40_s21 = sadd.s32 1, %s596_s14 }
   0x8   : > { %p33_p0 = scmp.ge.s32.totalorder %s31_s20, 2  ;;  %p47_p1 = scmp.ne.s32.totalorder %s596_s14, %s592_s13 }
   0x9   : > { %p48_p2 = scmp.eq.s32.totalorder %s608_s17, 0  ;;  %p53_p3 = scmp.ne.s32.totalorder %s592_s13, %s588_s12 }
   0xa   : > { %s837_s20 = smov (%p33_p0, %s31_s20), 0  ;;  %p54_p5 = scmp.eq.s32.totalorder %s407_s18, 0 }
   0xb   : > { %p675_p4 = por %p48_p2, %p47_p1  ;;  %s35_s23 = ssub.s32 %s604_s16, %s837_s20 }
   0xc   : > { %p121_p6 = scmp.eq.s32.totalorder %s407_s18, 1  ;;  %p38_p7 = scmp.eq.s32.totalorder %s35_s23, 0 }
   0xd   : > { %p681_p8 = por %p54_p5, %p53_p3  ;;  %p127_p10 = scmp.eq.s32.totalorder %s408_s19, 1 }
   0xe   : > { %p685_p9 = por %p121_p6, %p47_p1  ;;  %p439_p13 = scmp.lt.s32.totalorder %s608_s17, 2 }
   0xf   : > { %s690_s26 = scalar_select %p38_p7, %s596_s14, %s40_s21  }
  0x10   : > { %s823_s25 = scalar_select %p685_p9, 1, 0 }
  0x11   : > { %p692_p11 = por %p127_p10, %p53_p3  ;;  %s153_s28 = sand.u32 1, %s596_s14  }
  0x12   : > { %s411_s29 = sshll.u32 %s153_s28, 3  ;;  %s425_s30 = sshll.u32 %s604_s16, 7 }
  0x13   : > { %s824_s27 = scalar_select %p692_p11, 1, 0 }
  0x14   : > { %s703_s6 = scalar_lea.hbm %s816_s0, %s425_s30  ;;  %s157_s7 = scalar_lea.vmem [#allocation2], %s411_s29 }
  0x15   : > { %s167_s8 = sshll.u32 %s157_s7, 4  ;;  %p709_p0 = pnand %p439_p13, %p675_p4  ;;  %s705_s8 = int_to_ptr.vmem [resolvable:$true] %s167_s8 }
  0x16   : > { %s154_s10 = scalar_lea.sflag [#allocation3], %s153_s28  ;;  %s496_s11 = scalar_lea.hbm %s703_s6, 128 }
  0x17   : > { %p497_p3 = scmp.ne.s32.totalorder %s703_s6, %s496_s11  ;;  %p498_p5 = pneg %p709_p0 }
  0x18   : > { %s501_s21 = scalar_lea.hbm %s816_s0, 256  ;;  %p502_p4 = scmp.lt.u32.totalorder %s703_s6, %s816_s0 }
  0x19   : > { %p499_p6 = pnand %p498_p5, %p497_p3  ;;  %p503_p10 = scmp.lt.u32.totalorder %s501_s21, %s496_s11 }
  0x1a   : > { %p505_p12 = scmp.lt.u32.totalorder %s496_s11, %s703_s6 }
  0x1b   : > { %p500_p7 = pneg %p499_p6  ;;  %p504_p13 = por %p503_p10, %p502_p4 }
  0x1d   : > { %p506_p1 = por %p505_p12, %p504_p13 }
  0x1f   : > { %p507_p2 = pnand %p506_p1, %p500_p7 }
  0x21   : > { %510 = shalt.err (!%p507_p2)
}
  0x22   : > { %s511_s28 = scalar_lea.vmem %s705_s8, 128  ;;  %s610_s29 = smov [#allocation2]  }
  0x23   : > { %p512_p3 = scmp.ne.s32.totalorder %s705_s8, %s511_s28  ;;  %s516_s30 = sshll.u32 %s610_s29, 4  ;;  %s517_s30 = int_to_ptr.vmem [resolvable:$false] %s516_s30 }
  0x24   : > { %s518_s4 = scalar_lea.vmem %s517_s30, 256  ;;  %p519_p9 = scmp.lt.s32.totalorder %s705_s8, %s517_s30 }
  0x25   : > { %p514_p6 = pnand %p512_p3, %p498_p5  ;;  %p520_p4 = scmp.lt.s32.totalorder %s518_s4, %s511_s28 }
  0x27   : > { %p515_p11 = pneg %p514_p6  ;;  %p521_p10 = por %p520_p4, %p519_p9 }
  0x29   : > { %p522_p12 = pnand %p521_p10, %p515_p11 }
  0x2b   : > { %525 = shalt.err (!%p522_p12)
}
  0x2c   : > { %434 = dma.hbm_to_vmem [thread:$0]  (!%p709_p0), %s703_s6, 128, %s705_s8, %s154_s10  }
  0x2d   : > { %p826_p1 = scmp.lt.s32.totalorder %s608_s17, 3  ;;  %p827_p2 = scmp.ge.s32.totalorder %s608_s17, 1 }
  0x2f   : > { %p173_p5 = pnand %p827_p2, %p826_p1 }
  0x30   : > { %s745_s5 = sand.u32 (!%p173_p5), 1, %s592_s13  }
  0x31   : > { %176 = sbr.rel (%p173_p5) target bundleno = 308 (0x134), region = 32  ;;  %s415_s7 = sshll.u32 (!%p173_p5), %s745_s5, 3 }
  0x32   : > { %s179_s11 = scalar_lea.sflag (!%p173_p5), [#allocation3], %s745_s5  ;;  %s182_s9 = scalar_lea.vmem (!%p173_p5), [#allocation2], %s415_s7 }
  0x38   : > { %579 = dma.done.wait (%p681_p8), %s179_s11, 128  }
  0x39   : > { %581 = vsyncadd (%p681_p8), %s179_s11, 4294967168  ;;  %v611_v0 = vmov 0.0   ;;  %v612_v1 = vmov 0   ;;  %v207_v2 = vld [vmem:[%s182_s9] sm:$0xff]  ;;  %vm222_vm0 = vcmask 1043456   ;;  %vm218_vm1 = vcmask 31744  }
  0x3a   : > { %291 = vmatprep.mubr.f32.mxu0 %v611_v0  ;;  %491 = vset.pattern.permute.xlu0 %v612_v1  ;;  %v210_v3 = vld [vmem:[%s818_s2] sm:$0xf]  ;;  %v208_v4 = vmul.f32 %v207_v2, %v207_v2  ;;  %s426_s24 = sshll.u32 %s600_s15, 7  ;;  %s204_s19 = scalar_lea.vmem [#allocation5], %s415_s7 }
  0x3b   : > { %213 = vperm.xlu0 %491, %v210_v3   ;;  %v209_v6 = vld [vmem:[%s817_s1] sm:$0xf]  ;;  %s323_s21 = sshll.u32 %s204_s19, 4  ;;  %s767_s28 = scalar_lea.hbm %s819_s3, %s426_s24  ;;  %s769_s21 = int_to_ptr.vmem [resolvable:$true] %s323_s21 }
  0x3c   : > { %v217_v5 = vcombine.high %v208_v4, %v208_v4  ;;  %s307_s29 = scalar_lea.sflag [#allocation4], %s745_s5  ;;  %s526_s30 = scalar_lea.vmem %s769_s21, 128 }
  0x3d   : > { %p527_p8 = scmp.ne.s32.totalorder %s769_s21, %s526_s30  ;;  %p828_p9 = scmp.ne.s32.totalorder %s823_s25, 0 }
  0x3e   : > { %417 = vmatprep.subr.msk.mxu0 %vm222_vm0, %v217_v5  ;;  %s613_s15 = smov [#allocation5]  }
  0x3f   : > { %418 = vmatpush1.msk.msra.mxu0 %vm222_vm0, %v208_v4  ;;  %p528_p11 = pnand %p527_p8, %p828_p9  ;;  %s530_s4 = sshll.u32 %s613_s15, 4  ;;  %s531_s4 = int_to_ptr.vmem [resolvable:$false] %s530_s4 }
  0x40   : > { %419 = vmatmul.mubr.msk.f32.vlgmr.msra.gmra.mrb[0].mxu0 %vm218_vm1, %v209_v6  ;;  %s532_s7 = scalar_lea.vmem %s531_s4, 256  ;;  %p533_p7 = scmp.lt.s32.totalorder %s769_s21, %s531_s4 }
  0x41   : > { %p529_p0 = pneg %p528_p11  ;;  %p534_p13 = scmp.lt.s32.totalorder %s532_s7, %s526_s30 }
  0x43   : > { %p535_p3 = por %p534_p13, %p533_p7 }
  0x45   : > { %p536_p6 = pnand %p535_p3, %p529_p0 }
  0xba   : > { %v214_v7 = vpop.permute.xlu0 %213 }
 0x113   : > { %v293_v8 = vpop.f32.mrb[0].mxu0 }
 0x114   : > { %v294_v9 = vadd.f32 %v293_v8, %v214_v7  ;;  %v295_v10 = vpop.f32.mrb[1].mxu0 }
 0x115   : > { %v296_v11 = vadd.f32 %v295_v10, %v214_v7 }
 0x116   : > { %492 = vrsqrt.f32 %v294_v9 }
 0x117   : > { %494 = vrsqrt.f32 %v296_v11 }
 0x120   : > { %v493_v12 = vpop.eup %492 }
 0x121   : > { %v495_v13 = vpop.eup %494 }
 0x122   : > { %v302_v14 = vcombine.low %v493_v12, %v495_v13 }
 0x124   : > { %v304_v15 = vmul.f32 %v302_v14, %v207_v2 }
 0x126   : > { %305 = vst [vmem:[%s204_s19] sm:$0xff] %v304_v15 }
 0x127   : > { %539 = shalt.err (!%p536_p6)
}
 0x128   : > { %s540_s5 = scalar_lea.hbm %s767_s28, 128  ;;  %s544_s6 = scalar_lea.hbm %s819_s3, 256 }
 0x129   : > { %p541_p4 = scmp.ne.s32.totalorder %s767_s28, %s540_s5  ;;  %p545_p1 = scmp.lt.u32.totalorder %s767_s28, %s819_s3 }
 0x12a   : > { %p546_p2 = scmp.lt.u32.totalorder %s544_s6, %s540_s5  ;;  %p548_p8 = scmp.lt.u32.totalorder %s540_s5, %s767_s28 }
 0x12b   : > { %p542_p10 = pnand %p541_p4, %p828_p9 }
 0x12c   : > { %p547_p5 = por %p546_p2, %p545_p1 }
 0x12d   : > { %p543_p12 = pneg %p542_p10 }
 0x12e   : > { %p549_p11 = por %p548_p8, %p547_p5 }
 0x130   : > { %p550_p0 = pnand %p549_p11, %p543_p12 }
 0x132   : > { %553 = shalt.err (!%p550_p0)
}
 0x133   : > { %429 = dma.vmem_to_hbm [thread:$0]  (%p828_p9), %s769_s21, 128, %s767_s28, %s307_s29  }
 0x134 PF: > { %s335_s18 = sand.u32 1, %s588_s12   ;;  %p829_p7 = scmp.ne.s32.totalorder %s824_s27, 0 }
 0x135   : > { %p830_p13 = scmp.ge.s32.totalorder %s608_s17, 2  ;;  %s336_s24 = scalar_lea.sflag [#allocation4], %s335_s18 }
 0x137   : > { %p436_p3 = pnand %p830_p13, %p829_p7 }
 0x139   : > { %583 = dma.done.wait (!%p436_p3), %s336_s24, 128  }
 0x13a   : > { %585 = vsyncadd (!%p436_p3), %s336_s24, 4294967168  ;;  %s19_s17 = sadd.s32 1, %s608_s17   ;;  %s831_s12 = smov %s592_s13 }
 0x13b   : > { %p16_p6 = scmp.ge.s32.totalorder %s19_s17, 4   ;;  %s832_s13 = smov %s596_s14 }
 0x13c   : > { %s833_s14 = smov %s690_s26  ;;  %s834_s15 = smov %s604_s16 }
 0x13d   : > { %s835_s16 = smov %s837_s20  ;;  %18 = sbr.rel (!%p16_p6) target bundleno = 6 (0x6), region = 77 }
 0x144   :  { %341 = vsyncpa [#allocation3], 1 }
 0x145   :  { %343 = vsyncpa [#allocation3 + $0x1], 1 }
 0x146   :  { %344 = vsyncpa [#allocation4], 1 }
 0x147   :  { %346 = vsyncpa [#allocation4 + $0x1], 1 }

</bundles_post_ra>
